<compile_context>
chip_gen: v7x
topology: tpu7x:2x2x1
jax: 0.10.0
libtpu: 0.0.40
codegen_flags: <defaults>
</compile_context>

<pallas_src>
import jax
import jax.numpy as jnp
from jax.experimental import pallas as pl
from jax.experimental.pallas import tpu as pltpu

LANE = 128


def _round_up(n, m):
    return (n + m - 1) // m * m


def mlp_kernel(x_ref, w1_ref, b1_ref, w2_ref, b2_ref, o_ref):
    # x arrives as f32 straight from HBM; cast to bf16 here (VPU work hidden
    # under the streaming x-tile DMA).
    x = x_ref[...].astype(jnp.bfloat16)
    # fc1: (TB, 784) bf16 @ (784, 128) bf16 -> f32 accumulation on the MXU.
    h = jnp.dot(x, w1_ref[...], preferred_element_type=jnp.float32)
    # bias + ReLU in f32 on the VPU (safe on v5e, which has no bf16 VPU).
    h = jnp.maximum(h + b1_ref[...], 0.0)
    # fc2: (TB, 128) bf16 @ (128, 128) bf16 -> f32; lane-dense (TB, 128) store.
    o = jnp.dot(h.astype(jnp.bfloat16), w2_ref[...],
                preferred_element_type=jnp.float32)
    o_ref[...] = o + b2_ref[...]


def prepare_params(w1, b1, w2, b2):
    """One-time weight prep: bf16 matmul weights; pad only the class lane dim."""
    in_size, hidden = w1.shape
    num_classes = w2.shape[1]
    h_pad = _round_up(hidden, LANE)        # 128 -> 128
    c_pad = _round_up(num_classes, LANE)   # 10  -> 128 (lane-dense output store)

    w1p = jnp.zeros((in_size, h_pad), jnp.bfloat16)
    w1p = w1p.at[:, :hidden].set(w1.astype(jnp.bfloat16))
    b1p = jnp.zeros((1, h_pad), jnp.float32).at[0, :hidden].set(b1)
    w2p = jnp.zeros((h_pad, c_pad), jnp.bfloat16)
    w2p = w2p.at[:hidden, :num_classes].set(w2.astype(jnp.bfloat16))
    b2p = jnp.zeros((1, c_pad), jnp.float32).at[0, :num_classes].set(b2)
    return w1p, b1p, w2p, b2p, (in_size, hidden, num_classes)


def mlp_forward(x, prepared, tile_b=None):
    """x: (B, C, H, W) float32. Returns logits (B, num_classes) float32."""
    w1p, b1p, w2p, b2p, (in_size, hidden, num_classes) = prepared
    h_pad = w1p.shape[1]
    c_pad = w2p.shape[1]

    B = x.shape[0]
    x_flat = x.reshape(B, -1)              # matches torch x.view(B, -1); stays f32
    assert x_flat.shape[1] == in_size

    # tile_b: 8-aligned, capped at 512 rows (double-buffered footprint ~few MiB,
    # well under even v7x's 64 MiB VMEM); aim for >=2 grid steps so the batch axis
    # can shard across both v7x TensorCores. No batch over-padding: partial last
    # blocks are handled by Pallas (garbage rows are independent and never read
    # back as real logits).
    b_aligned = _round_up(B, 8)
    if tile_b is None:
        tile_b = min(512, max(8, _round_up(pl.cdiv(b_aligned, 2), 8)))
    tile_b = max(8, min(_round_up(tile_b, 8), b_aligned))
    grid = (pl.cdiv(B, tile_b),)

    # Unpadded traffic/flop hints so XLA schedules around the call sensibly.
    flops = 2 * B * (in_size * h_pad + h_pad * c_pad)
    bytes_accessed = (x_flat.size * 4 + w1p.size * 2 + w2p.size * 2
                      + b1p.size * 4 + b2p.size * 4 + B * c_pad * 4)

    out = pl.pallas_call(
        mlp_kernel,
        out_shape=jax.ShapeDtypeStruct((B, c_pad), jnp.float32),
        grid=grid,
        in_specs=[
            # x streams one batch tile per step; K=784 is the full array dim,
            # so the block is legal without any 784->896 padding or copy.
            pl.BlockSpec((tile_b, in_size), lambda i: (i, 0)),
            pl.BlockSpec((in_size, h_pad), lambda i: (0, 0)),   # w1 resident
            pl.BlockSpec((1, h_pad), lambda i: (0, 0)),         # b1 resident
            pl.BlockSpec((h_pad, c_pad), lambda i: (0, 0)),     # w2 resident
            pl.BlockSpec((1, c_pad), lambda i: (0, 0)),         # b2 resident
        ],
        out_specs=pl.BlockSpec((tile_b, c_pad), lambda i: (i, 0)),
        compiler_params=pltpu.CompilerParams(
            dimension_semantics=("parallel",)),                 # megacore on v7x
        cost_estimate=pl.CostEstimate(
            flops=flops, transcendentals=0, bytes_accessed=bytes_accessed),
    )(x_flat, w1p, b1p, w2p, b2p)

    # Only the 10 real logit lanes are returned; no batch padding to drop.
    return out[:, :num_classes]


def init_params(key, input_size=784, hidden_size=128, num_classes=10):
    """Deterministic init mimicking nn.Linear default (U(-1/sqrt(fan_in), +1/sqrt(fan_in)))."""
    k1, k2, k3, k4 = jax.random.split(key, 4)
    bound1 = 1.0 / (input_size ** 0.5)
    bound2 = 1.0 / (hidden_size ** 0.5)
    w1 = jax.random.uniform(k1, (input_size, hidden_size), jnp.float32, -bound1, bound1)
    b1 = jax.random.uniform(k2, (hidden_size,), jnp.float32, -bound1, bound1)
    w2 = jax.random.uniform(k3, (hidden_size, num_classes), jnp.float32, -bound2, bound2)
    b2 = jax.random.uniform(k4, (num_classes,), jnp.float32, -bound2, bound2)
    return w1, b1, w2, b2


if __name__ == "__main__":
    key = jax.random.PRNGKey(0)
    kx, kp = jax.random.split(key)

    # MNIST-like input: batch=8, NCHW (8, 1, 28, 28) -> flattens to 784 features.
    x = jax.random.normal(kx, (8, 1, 28, 28), dtype=jnp.float32)
    w1, b1, w2, b2 = init_params(kp)

    prepared = prepare_params(w1, b1, w2, b2)
    out = mlp_forward(x, prepared)
    out = jax.block_until_ready(out)

    # Pure-JAX f32 reference (bf16 MXU operands -> loosened tolerance).
    x_flat = x.reshape(x.shape[0], -1)
    ref = jnp.maximum(x_flat @ w1 + b1, 0.0) @ w2 + b2
    assert out.shape == (8, 10)
    assert jnp.allclose(out, ref, atol=5e-2, rtol=5e-2), float(jnp.max(jnp.abs(out - ref)))

    print("KERNEL_OK")
</pallas_src>

<mosaic_0001>
module attributes {stable_mosaic.version = 11 : i64} {
  func.func @mlp_kernel(%arg0: i32, %arg1: memref<8x784xf32, #tpu.memory_space<vmem>>, %arg2: memref<784x128xbf16, #tpu.memory_space<vmem>>, %arg3: memref<1x128xf32, #tpu.memory_space<vmem>>, %arg4: memref<128x128xbf16, #tpu.memory_space<vmem>>, %arg5: memref<1x128xf32, #tpu.memory_space<vmem>>, %arg6: memref<8x128xf32, #tpu.memory_space<vmem>>) attributes {dimension_semantics = [#tpu.dimension_semantics<parallel>], iteration_bounds = array<i64: 1>, scalar_prefetch = 0 : i64, scratch_operands = 0 : i64, tpu.core_type = #tpu.core_type<tc>, window_params = [{transform_indices = @transform_0, window_bounds = array<i64: 8, 784>}, {pipeline_mode = #tpu.pipeline_mode<synchronous>, transform_indices = @transform_1, window_bounds = array<i64: 784, 128>}, {pipeline_mode = #tpu.pipeline_mode<synchronous>, transform_indices = @transform_2, window_bounds = array<i64: 1, 128>}, {pipeline_mode = #tpu.pipeline_mode<synchronous>, transform_indices = @transform_3, window_bounds = array<i64: 128, 128>}, {pipeline_mode = #tpu.pipeline_mode<synchronous>, transform_indices = @transform_4, window_bounds = array<i64: 1, 128>}, {transform_indices = @transform_5, window_bounds = array<i64: 8, 128>}]} {
    %c0 = arith.constant 0 : index
    %c0_0 = arith.constant 0 : index
    %0 = vector.load %arg1[%c0, %c0_0] : memref<8x784xf32, #tpu.memory_space<vmem>>, vector<8x784xf32>
    %1 = arith.truncf %0 : vector<8x784xf32> to vector<8x784xbf16>
    %c0_1 = arith.constant 0 : index
    %c0_2 = arith.constant 0 : index
    %2 = vector.load %arg2[%c0_1, %c0_2] : memref<784x128xbf16, #tpu.memory_space<vmem>>, vector<784x128xbf16>
    %cst = arith.constant dense<0.000000e+00> : vector<8x128xf32>
    %3 = tpu.matmul %1, %2, %cst {dimension_numbers = #tpu.dot_dimension_numbers<[1], [0], [0], [1], [0, 0, 1, 1], [], []>} : vector<8x784xbf16>, vector<784x128xbf16>, vector<8x128xf32> -> vector<8x128xf32>
    %c0_3 = arith.constant 0 : index
    %c0_4 = arith.constant 0 : index
    %4 = vector.load %arg3[%c0_3, %c0_4] : memref<1x128xf32, #tpu.memory_space<vmem>>, vector<1x128xf32>
    %5 = vector.broadcast %4 : vector<1x128xf32> to vector<8x128xf32>
    %6 = arith.addf %3, %5 : vector<8x128xf32>
    %cst_5 = arith.constant 0.000000e+00 : f32
    %7 = vector.broadcast %cst_5 : f32 to vector<8x128xf32>
    %8 = arith.maximumf %6, %7 : vector<8x128xf32>
    %9 = arith.truncf %8 : vector<8x128xf32> to vector<8x128xbf16>
    %c0_6 = arith.constant 0 : index
    %c0_7 = arith.constant 0 : index
    %10 = vector.load %arg4[%c0_6, %c0_7] : memref<128x128xbf16, #tpu.memory_space<vmem>>, vector<128x128xbf16>
    %cst_8 = arith.constant dense<0.000000e+00> : vector<8x128xf32>
    %11 = tpu.matmul %9, %10, %cst_8 {dimension_numbers = #tpu.dot_dimension_numbers<[1], [0], [0], [1], [0, 0, 1, 1], [], []>} : vector<8x128xbf16>, vector<128x128xbf16>, vector<8x128xf32> -> vector<8x128xf32>
    %c0_9 = arith.constant 0 : index
    %c0_10 = arith.constant 0 : index
    %12 = vector.load %arg5[%c0_9, %c0_10] : memref<1x128xf32, #tpu.memory_space<vmem>>, vector<1x128xf32>
    %13 = vector.broadcast %12 : vector<1x128xf32> to vector<8x128xf32>
    %14 = arith.addf %11, %13 : vector<8x128xf32>
    %c0_11 = arith.constant 0 : index
    %c0_12 = arith.constant 0 : index
    %15 = vector.load %arg6[%c0_11, %c0_12] : memref<8x128xf32, #tpu.memory_space<vmem>>, vector<8x128xf32>
    tpu.vector_store %arg6[%c0_11, %c0_12], %14 {strides = array<i32>} : memref<8x128xf32, #tpu.memory_space<vmem>>, vector<8x128xf32>,
    return
  }
  func.func @transform_0(%arg0: i32) -> (i32, i32) {
    %c0_i32 = arith.constant 0 : i32
    %c0_i32_0 = arith.constant 0 : i32
    return %arg0, %c0_i32 : i32, i32
  }
  func.func @transform_1(%arg0: i32) -> (i32, i32) {
    %c0_i32 = arith.constant 0 : i32
    %c0_i32_0 = arith.constant 0 : i32
    %c0_i32_1 = arith.constant 0 : i32
    return %c0_i32, %c0_i32_0 : i32, i32
  }
  func.func @transform_2(%arg0: i32) -> (i32, i32) {
    %c0_i32 = arith.constant 0 : i32
    %c0_i32_0 = arith.constant 0 : i32
    %c0_i32_1 = arith.constant 0 : i32
    return %c0_i32, %c0_i32_0 : i32, i32
  }
  func.func @transform_3(%arg0: i32) -> (i32, i32) {
    %c0_i32 = arith.constant 0 : i32
    %c0_i32_0 = arith.constant 0 : i32
    %c0_i32_1 = arith.constant 0 : i32
    return %c0_i32, %c0_i32_0 : i32, i32
  }
  func.func @transform_4(%arg0: i32) -> (i32, i32) {
    %c0_i32 = arith.constant 0 : i32
    %c0_i32_0 = arith.constant 0 : i32
    %c0_i32_1 = arith.constant 0 : i32
    return %c0_i32, %c0_i32_0 : i32, i32
  }
  func.func @transform_5(%arg0: i32) -> (i32, i32) {
    %c0_i32 = arith.constant 0 : i32
    %c0_i32_0 = arith.constant 0 : i32
    return %arg0, %c0_i32 : i32, i32
  }
}

</mosaic_0001>

<bundles_post_ra>
// kernel: tpu_custom_call.1
= control target key start
LH: loop header
LB: loop body
LE: loop exit
PB: predicated region body
PF: predicated region fallthrough
CT: control target
= control target key end

     0   :  { %10 = vsyncpa [#allocation3], 0  ;;  %s1201_s0 = inlined_call_operand.hbm [shape: f32[8,784], index: 0, kind: input, shape index: {}]   ;;  %s1202_s1 = inlined_call_operand.hbm [shape: bf16[784,128], index: 1, kind: input, shape index: {}]   ;;  %s1203_s2 = inlined_call_operand.vmem [shape: f32[1,128], index: 2, kind: input, shape index: {}]   ;;  %s1204_s3 = inlined_call_operand.hbm [shape: bf16[128,128], index: 3, kind: input, shape index: {}]   ;;  %s1205_s4 = inlined_call_operand.vmem [shape: f32[1,128], index: 4, kind: input, shape index: {}]   ;;  %s1206_s5 = inlined_call_operand.hbm [shape: f32[8,128], index: 5, kind: output, shape index: {}]  }
   0x1   :  { %11 = vsyncpa [#allocation6], 0 }
   0x2   :  { %12 = vsyncpa [#allocation4], 0  ;;  %s1090_s18 = smov [#allocation5]   ;;  %s996_s22 = scalar_lea.hbm %s1202_s1, 6272 }
   0x3   :  { %s28_s19 = sshll.u32 %s1090_s18, 4  ;;  %p997_p0 = scmp.ne.s32.totalorder %s1202_s1, %s996_s22  ;;  %s29_s19 = int_to_ptr.vmem [resolvable:$true] %s28_s19 }
   0x4   :  { %p1000_p1 = scmp.lt.u32.totalorder %s996_s22, %s1202_s1 }
   0x6   :  { %p1002_p2 = pnand %p1000_p1, %p997_p0 }
   0x8   :  { %1005 = shalt.err (!%p1002_p2)
}
   0x9   :  { %s1006_s27 = scalar_lea.vmem %s29_s19, 6272  ;;  %p1011_p4 = scmp.lt.s32.totalorder %s29_s19, %s29_s19 }
   0xa   :  { %p1007_p3 = scmp.ne.s32.totalorder %s29_s19, %s1006_s27  ;;  %p1012_p5 = scmp.lt.s32.totalorder %s1006_s27, %s1006_s27 }
   0xc   :  { %p1013_p6 = por %p1012_p5, %p1011_p4 }
   0xe   :  { %p1014_p7 = pnand %p1013_p6, %p1007_p3 }
  0x10   :  { %1017 = shalt.err (!%p1014_p7)
}
  0x11   :  { %s1091_s28 = smov 64   ;;  %s1092_s29 = smov 4  }
  0x12   :  { %34 = dma.hbm_to_vmem [thread:$0]  %s1202_s1, 6272, %s29_s19, [#allocation6], %s1091_s28, %s1091_s28, %s1092_s29  }
  0x13   :  { %s1093_s7 = smov [#allocation2]   ;;  %s1094_s9 = smov [#allocation7]  }
  0x14   :  { %s19_s8 = sshll.u32 %s1093_s7, 4  ;;  %s42_s10 = sshll.u32 %s1094_s9, 4  ;;  %s20_s8 = int_to_ptr.vmem [resolvable:$true] %s19_s8  ;;  %s43_s10 = int_to_ptr.vmem [resolvable:$true] %s42_s10 }
  0x15   :  { %s1018_s13 = scalar_lea.hbm %s1201_s0, 896 }
  0x16   :  { %p1019_p8 = scmp.ne.s32.totalorder %s1201_s0, %s1018_s13  ;;  %p1022_p9 = scmp.lt.u32.totalorder %s1018_s13, %s1201_s0 }
  0x18   :  { %p1024_p10 = pnand %p1022_p9, %p1019_p8 }
  0x1a   :  { %1027 = shalt.err (!%p1024_p10)
}
  0x1b   :  { %s1028_s1 = scalar_lea.vmem %s20_s8, 896  ;;  %p1033_p12 = scmp.lt.s32.totalorder %s20_s8, %s20_s8 }
  0x1c   :  { %p1029_p11 = scmp.ne.s32.totalorder %s20_s8, %s1028_s1  ;;  %p1034_p13 = scmp.lt.s32.totalorder %s1028_s1, %s1028_s1 }
  0x1e   :  { %p1035_p0 = por %p1034_p13, %p1033_p12 }
  0x20   :  { %p1036_p1 = pnand %p1035_p0, %p1029_p11 }
  0x22   :  { %1039 = shalt.err (!%p1036_p1)
}
  0x23   :  { %22 = dma.hbm_to_vmem [thread:$0]  %s1201_s0, 896, %s20_s8, [#allocation3]  }
  0x24   :  { %s1040_s22 = scalar_lea.hbm %s1204_s3, 1024 }
  0x25   :  { %p1041_p2 = scmp.ne.s32.totalorder %s1204_s3, %s1040_s22  ;;  %p1044_p3 = scmp.lt.u32.totalorder %s1040_s22, %s1204_s3 }
  0x27   :  { %p1046_p4 = pnand %p1044_p3, %p1041_p2 }
  0x29   :  { %1049 = shalt.err (!%p1046_p4)
}
  0x2a   :  { %s1050_s27 = scalar_lea.vmem %s43_s10, 1024  ;;  %p1055_p6 = scmp.lt.s32.totalorder %s43_s10, %s43_s10 }
  0x2b   :  { %p1051_p5 = scmp.ne.s32.totalorder %s43_s10, %s1050_s27  ;;  %p1056_p7 = scmp.lt.s32.totalorder %s1050_s27, %s1050_s27 }
  0x2d   :  { %p1057_p8 = por %p1056_p7, %p1055_p6 }
  0x2f   :  { %p1058_p9 = pnand %p1057_p8, %p1051_p5 }
  0x31   :  { %1061 = shalt.err (!%p1058_p9)
}
  0x32   :  { %48 = dma.hbm_to_vmem [thread:$0]  %s1204_s3, 1024, %s43_s10, [#allocation6], %s1091_s28, %s1091_s28, %s1092_s29  }
  0x33   :  { %1084 = dma.done.wait [#allocation3], 896  }
  0x34   :  { %1085 = vsyncadd [#allocation3], 4294966400 }
  0x35   :  { %1086 = dma.done.wait [#allocation6], 7296  }
  0x36   :  { %1087 = vsyncadd [#allocation6], 4294960000  ;;  %v939_v0 = vld [vmem:[#allocation5 + $0x40] sm:$0xff]   ;;  %v943_v4 = vld [vmem:[#allocation5 + $0x48] sm:$0xff]   ;;  %v1095_v44 = vmov 0.0   ;;  %vm1096_vm0 = vmmov 0  }
  0x37   :  { %v940_v1 = vld [vmem:[#allocation5] sm:$0xff]   ;;  %828 = vmatprep.subr.bf16.mxu0 %v939_v0  ;;  %v944_v5 = vld [vmem:[#allocation5 + $0x8] sm:$0xff]   ;;  %v947_v8 = vld [vmem:[#allocation5 + $0x50] sm:$0xff]   ;;  %vm474_vm1 = vcmask 130048   ;;  %s1097_s6 = smov [#allocation8]  }
  0x38   :  { %v941_v2 = vld [vmem:[#allocation5 + $0xc0] sm:$0xff]   ;;  %829 = vmatpush3.bf16.msra.mxu0 %v940_v1  ;;  %v945_v6 = vld [vmem:[#allocation5 + $0xc8] sm:$0xff]   ;;  %v948_v9 = vld [vmem:[#allocation5 + $0x10] sm:$0xff]   ;;  %s758_s7 = sshll.u32 %s1097_s6, 4  ;;  %s759_s7 = int_to_ptr.vmem [resolvable:$true] %s758_s7 }
  0x39   :  { %v942_v3 = vld [vmem:[#allocation5 + $0x80] sm:$0xff]   ;;  %850 = vmatprep.subr.bf16.mxu1 %v941_v2  ;;  %830 = vmatprep.subr.bf16.mxu0 %v943_v4  ;;  %v946_v7 = vld [vmem:[#allocation5 + $0x88] sm:$0xff]   ;;  %v949_v10 = vld [vmem:[#allocation5 + $0xd0] sm:$0xff]   ;;  %s1062_s8 = scalar_lea.vmem %s759_s7, 128  ;;  %p1067_p11 = scmp.lt.s32.totalorder %s759_s7, %s759_s7 }
  0x3a   :  { %851 = vmatpush3.bf16.msra.mxu1 %v942_v3  ;;  %v950_v11 = vld [vmem:[#allocation5 + $0x90] sm:$0xff]   ;;  %v951_v12 = vld [vmem:[#allocation5 + $0x58] sm:$0xff]   ;;  %v955_v16 = vld [vmem:[#allocation5 + $0x60] sm:$0xff]   ;;  %p1063_p10 = scmp.ne.s32.totalorder %s759_s7, %s1062_s8  ;;  %p1068_p12 = scmp.lt.s32.totalorder %s1062_s8, %s1062_s8 }
  0x3b   :  { %852 = vmatprep.subr.bf16.mxu1 %v945_v6  ;;  %v952_v13 = vld [vmem:[#allocation5 + $0x18] sm:$0xff]   ;;  %v956_v17 = vld [vmem:[#allocation5 + $0x20] sm:$0xff]   ;;  %v959_v20 = vld [vmem:[#allocation5 + $0x68] sm:$0xff]  }
  0x3c   :  { %831 = vmatpush3.bf16.msra.mxu0 %v944_v5  ;;  %v953_v14 = vld [vmem:[#allocation5 + $0xd8] sm:$0xff]   ;;  %v957_v18 = vld [vmem:[#allocation5 + $0xe0] sm:$0xff]   ;;  %v960_v21 = vld [vmem:[#allocation5 + $0x28] sm:$0xff]   ;;  %p1069_p13 = por %p1068_p12, %p1067_p11 }
  0x3d   :  { %832 = vmatprep.subr.bf16.mxu0 %v947_v8  ;;  %v954_v15 = vld [vmem:[#allocation5 + $0x98] sm:$0xff]   ;;  %v958_v19 = vld [vmem:[#allocation5 + $0xa0] sm:$0xff]   ;;  %v961_v22 = vld [vmem:[#allocation5 + $0xe8] sm:$0xff]  }
  0x3e   :  { %853 = vmatpush3.bf16.msra.mxu1 %v946_v7  ;;  %v962_v23 = vld [vmem:[#allocation5 + $0xa8] sm:$0xff]   ;;  %v963_v24 = vld [vmem:[#allocation5 + $0x70] sm:$0xff]   ;;  %v967_v28 = vld [vmem:[#allocation5 + $0x78] sm:$0xff]   ;;  %p1070_p0 = pnand %p1069_p13, %p1063_p10 }
  0x3f   :  { %854 = vmatprep.subr.bf16.mxu1 %v949_v10  ;;  %v964_v25 = vld [vmem:[#allocation5 + $0x30] sm:$0xff]   ;;  %v968_v29 = vld [vmem:[#allocation5 + $0x38] sm:$0xff]   ;;  %v61_v34 = vld [vmem:[#allocation2] sm:$0xff] }
  0x40   :  { %833 = vmatpush3.bf16.msra.mxu0 %v948_v9  ;;  %v965_v26 = vld [vmem:[#allocation5 + $0xf0] sm:$0xff]   ;;  %v969_v30 = vld [vmem:[#allocation5 + $0xf8] sm:$0xff]   ;;  %v68_v35 = vpack.c.bf16 %v61_v34, %v61_v34  ;;  %v971_v36 = vld [vmem:[#allocation5 + $0x140] sm:$0xff]  }
  0x41   :  { %834 = vmatprep.subr.bf16.mxu0 %v951_v12  ;;  %v966_v27 = vld [vmem:[#allocation5 + $0xb0] sm:$0xff]   ;;  %v970_v33 = vld [vmem:[#allocation5 + $0xb8] sm:$0xff]   ;;  %v64_v37 = vld [vmem:[#allocation2 + $0x18] sm:$0xff] }
  0x42   :  { %855 = vmatpush3.bf16.msra.mxu1 %v950_v11  ;;  %v62_v31 = vld [vmem:[#allocation2 + $0x8] sm:$0xff]  ;;  %v71_v38 = vpack.c.bf16 %v64_v37, %v64_v37  ;;  %v972_v39 = vld [vmem:[#allocation5 + $0x100] sm:$0xff]   ;;  %v63_v40 = vld [vmem:[#allocation2 + $0x10] sm:$0xff] }
  0x43   :  { %856 = vmatprep.subr.bf16.mxu1 %v953_v14  ;;  %v69_v32 = vpack.c.bf16 %v62_v31, %v62_v31  ;;  %v70_v41 = vpack.c.bf16 %v63_v40, %v63_v40  ;;  %v973_v42 = vld [vmem:[#allocation5 + $0x148] sm:$0xff]   ;;  %v975_v45 = vld [vmem:[#allocation5 + $0x150] sm:$0xff]   ;;  %v977_v47 = vld [vmem:[#allocation5 + $0x158] sm:$0xff]  }
  0x44   :  { %835 = vmatpush3.bf16.msra.mxu0 %v952_v13  ;;  %550 = vmatprep.mubr.bf16.mxu1 %v71_v38  ;;  %v974_v43 = vld [vmem:[#allocation5 + $0x108] sm:$0xff]   ;;  %v976_v46 = vld [vmem:[#allocation5 + $0x110] sm:$0xff]   ;;  %v978_v48 = vld [vmem:[#allocation5 + $0x118] sm:$0xff]  }
  0x45   :  { %836 = vmatprep.subr.bf16.mxu0 %v955_v16  ;;  %510 = vmatprep.mubr.bf16.mxu0 %v69_v32  ;;  %v979_v49 = vld [vmem:[#allocation5 + $0x160] sm:$0xff]   ;;  %v981_v51 = vld [vmem:[#allocation5 + $0x168] sm:$0xff]   ;;  %v66_v54 = vld [vmem:[#allocation2 + $0x28] sm:$0xff] }
  0x46   :  { %857 = vmatpush3.bf16.msra.mxu1 %v954_v15  ;;  %v980_v50 = vld [vmem:[#allocation5 + $0x120] sm:$0xff]   ;;  %v982_v52 = vld [vmem:[#allocation5 + $0x128] sm:$0xff]   ;;  %v983_v55 = vld [vmem:[#allocation5 + $0x170] sm:$0xff]   ;;  %v73_v56 = vpack.c.bf16 %v66_v54, %v66_v54 }
  0x47   :  { %858 = vmatprep.subr.bf16.mxu1 %v957_v18  ;;  %v987_v53 = vld [vmem:[#allocation5 + $0x180] sm:$0xff]   ;;  %v67_v57 = vld [vmem:[#allocation2 + $0x30] sm:$0xff]  ;;  %v984_v59 = vld [vmem:[#allocation5 + $0x130] sm:$0xff]  }
  0x48   :  { %837 = vmatpush3.bf16.msra.mxu0 %v956_v17  ;;  %v74_v58 = vpack.c.bf16 %v67_v57, %v67_v57  ;;  %v985_v60 = vld [vmem:[#allocation5 + $0x178] sm:$0xff]   ;;  %v65_v62 = vld [vmem:[#allocation2 + $0x20] sm:$0xff]  ;;  %v989_v1 = vld [vmem:[#allocation7 + $0x8] sm:$0xff]  }
  0x49   :  { %838 = vmatprep.subr.bf16.mxu0 %v959_v20  ;;  %v986_v61 = vld [vmem:[#allocation5 + $0x138] sm:$0xff]   ;;  %v72_v63 = vpack.c.bf16 %v65_v62, %v65_v62  ;;  %v988_v0 = vld [vmem:[#allocation7] sm:$0xff]   ;;  %v991_v3 = vld [vmem:[#allocation7 + $0x18] sm:$0xff]  }
  0x4a   :  { %859 = vmatpush3.bf16.msra.mxu1 %v958_v19  ;;  %v990_v2 = vld [vmem:[#allocation7 + $0x10] sm:$0xff]   ;;  %v992_v4 = vld [vmem:[#allocation7 + $0x20] sm:$0xff]   ;;  %v993_v5 = vld [vmem:[#allocation7 + $0x28] sm:$0xff]  }
  0x4b   :  { %860 = vmatprep.subr.bf16.mxu1 %v961_v22  ;;  %v994_v6 = vld [vmem:[#allocation7 + $0x30] sm:$0xff]   ;;  %v995_v7 = vld [vmem:[#allocation7 + $0x38] sm:$0xff]   ;;  %v768_v9 = vld [vmem:[%s1203_s2] ss:$0 sm:$0xff] }
  0x4c   :  { %839 = vmatpush3.bf16.msra.mxu0 %v960_v21  ;;  %v819_v34 = vld [vmem:[%s1205_s4] ss:$0 sm:$0xff] }
  0x4d   :  { %840 = vmatprep.subr.bf16.mxu0 %v963_v24 }
  0x4e   :  { %861 = vmatpush3.bf16.msra.mxu1 %v962_v23 }
  0x4f   :  { %862 = vmatprep.subr.bf16.mxu1 %v965_v26 }
  0x50   :  { %841 = vmatpush3.bf16.msra.mxu0 %v964_v25 }
  0x51   :  { %842 = vmatprep.subr.bf16.mxu0 %v967_v28 }
  0x52   :  { %863 = vmatpush3.bf16.msra.mxu1 %v966_v27 }
  0x53   :  { %864 = vmatprep.subr.bf16.mxu1 %v969_v30 }
  0x54   :  { %843 = vmatpush3.bf16.msra.mxu0 %v968_v29 }
  0x55   :  { %872 = vmatprep.subr.bf16.mxu0 %v971_v36 }
  0x56   :  { %865 = vmatpush3.bf16.msra.mxu1 %v970_v33 }
  0x57   :  { %511 = vmatmul.mubr.bf16.vlgmr.msra.gmra.mrb[0].mxu0 %v68_v35  ;;  %905 = vmatprep.subr.bf16.mxu1 %v1095_v44 }
  0x58   :  { %873 = vmatpush3.bf16.msra.mxu0 %v972_v39  ;;  %590 = vmatprep.mubr.bf16.mxu0 %v73_v56 }
  0x59   :  { %551 = vmatmul.mubr.bf16.vlgmr.msra.gmra.mrb[0].mxu1 %v70_v41  ;;  %874 = vmatprep.subr.bf16.mxu0 %v973_v42 }
  0x5a   :  { %907 = vmatprep.mubr.msk.bf16.mxu1 %vm1096_vm0, %v1095_v44  ;;  %906 = vmatpush3.bf16.msra.mxu1 %v987_v53 }
  0x5b   :  { %911 = vmatprep.subr.bf16.mxu1 %v1095_v44 }
  0x5c   :  { %875 = vmatpush3.bf16.msra.mxu0 %v974_v43 }
  0x5d   :  { %876 = vmatprep.subr.bf16.mxu0 %v975_v45 }
  0x60   :  { %877 = vmatpush3.bf16.msra.mxu0 %v976_v46 }
  0x61   :  { %878 = vmatprep.subr.bf16.mxu0 %v977_v47  ;;  %908 = vmatmul.mubr.msk.bf16.vlgmr.msra.gmra.mrb[4].mxu1 %vm474_vm1, %v74_v58 }
  0x62   :  { %927 = vmatprep.mubr.msk.bf16.mxu1 %vm1096_vm0, %v1095_v44  ;;  %912 = vmatpush3.bf16.msra.mxu1 %v988_v0 }
  0x63   :  { %913 = vmatprep.subr.bf16.mxu1 %v1095_v44 }
  0x64   :  { %879 = vmatpush3.bf16.msra.mxu0 %v978_v48 }
  0x65   :  { %880 = vmatprep.subr.bf16.mxu0 %v979_v49 }
  0x66   :  { %914 = vmatpush3.bf16.msra.mxu1 %v989_v1 }
  0x67   :  { %915 = vmatprep.subr.bf16.mxu1 %v1095_v44 }
  0x68   :  { %881 = vmatpush3.bf16.msra.mxu0 %v980_v50 }
  0x69   :  { %882 = vmatprep.subr.bf16.mxu0 %v981_v51 }
  0x6a   :  { %916 = vmatpush3.bf16.msra.mxu1 %v990_v2 }
  0x6b   :  { %917 = vmatprep.subr.bf16.mxu1 %v1095_v44 }
  0x6c   :  { %883 = vmatpush3.bf16.msra.mxu0 %v982_v52 }
  0x6d   :  { %884 = vmatprep.subr.bf16.mxu0 %v983_v55 }
  0x6e   :  { %918 = vmatpush3.bf16.msra.mxu1 %v991_v3 }
  0x6f   :  { %919 = vmatprep.subr.bf16.mxu1 %v1095_v44 }
  0x70   :  { %885 = vmatpush3.bf16.msra.mxu0 %v984_v59 }
  0x71   :  { %886 = vmatprep.subr.bf16.mxu0 %v985_v60 }
  0x72   :  { %920 = vmatpush3.bf16.msra.mxu1 %v992_v4 }
  0x73   :  { %921 = vmatprep.subr.bf16.mxu1 %v1095_v44 }
  0x74   :  { %887 = vmatpush3.bf16.msra.mxu0 %v986_v61 }
  0x76   :  { %922 = vmatpush3.bf16.msra.mxu1 %v993_v5 }
  0x77   :  { %591 = vmatmul.mubr.bf16.vlgmr.msra.gmra.mrb[4].mxu0 %v72_v63  ;;  %923 = vmatprep.subr.bf16.mxu1 %v1095_v44 }
  0x7a   :  { %924 = vmatpush3.bf16.msra.mxu1 %v994_v6 }
  0x7b   :  { %925 = vmatprep.subr.bf16.mxu1 %v1095_v44 }
  0x7e   :  { %926 = vmatpush3.bf16.msra.mxu1 %v995_v7 }
 0x12a   :  { %v844_v8 = vpop.f32.mrb[0].mxu0 }
 0x12b   :  { %v845_v10 = vpop.f32.mrb[1].mxu0 }
 0x12c   :  { %v846_v11 = vadd.f32 %v845_v10, %v844_v8  ;;  %v847_v12 = vpop.f32.mrb[2].mxu0  ;;  %v866_v13 = vpop.f32.mrb[0].mxu1 }
 0x12d   :  { %v848_v14 = vpop.f32.mrb[3].mxu0  ;;  %v867_v16 = vpop.f32.mrb[1].mxu1 }
 0x12e   :  { %v513_v15 = vadd.f32 %v846_v11, %v768_v9  ;;  %v868_v17 = vadd.f32 %v867_v16, %v866_v13  ;;  %v869_v18 = vpop.f32.mrb[2].mxu1 }
 0x12f   :  { %v870_v19 = vpop.f32.mrb[3].mxu1 }
 0x130   :  { %v553_v20 = vadd.f32 %v868_v17, %v513_v15 }
 0x134   :  { %v632_v21 = vpop.f32.mrb[4].mxu1 }
 0x135   :  { %v909_v22 = vpop.f32.mrb[5].mxu1 }
 0x136   :  { %v635_v23 = vpop.f32.mrb[6].mxu1 }
 0x137   :  { %v910_v24 = vpop.f32.mrb[7].mxu1 }
 0x14a   :  { %v888_v25 = vpop.f32.mrb[4].mxu0 }
 0x14b   :  { %v889_v26 = vpop.f32.mrb[5].mxu0 }
 0x14c   :  { %v890_v27 = vadd.f32 %v889_v26, %v888_v25  ;;  %v891_v28 = vpop.f32.mrb[6].mxu0 }
 0x14d   :  { %v892_v29 = vpop.f32.mrb[7].mxu0 }
 0x14e   :  { %v593_v30 = vadd.f32 %v890_v27, %v553_v20 }
 0x150   :  { %v633_v31 = vadd.f32 %v632_v21, %v593_v30 }
 0x152   :  { %v638_v32 = vmax.f32 %v633_v31, 0.0 }
 0x154   :  { %v639_v33 = vpack.c.bf16 %v638_v32, %v638_v32 }
 0x156   :  { %928 = vmatmul.mubr.bf16.vlgmr.msra.gmra.mrb[8].mxu1 %v639_v33 }
 0x229   :  { %v745_v35 = vpop.f32.mrb[8].mxu1 }
 0x22a   :  { %v746_v36 = vadd.f32 %v819_v34, %v745_v35  ;;  %v929_v37 = vpop.f32.mrb[9].mxu1 }
 0x22b   :  { %v748_v38 = vpop.f32.mrb[10].mxu1 }
 0x22c   :  { %751 = vst [vmem:[#allocation8] sm:$0xff] %v746_v36  ;;  %v930_v39 = vpop.f32.mrb[11].mxu1 }
 0x22d   :  { %1073 = shalt.err (!%p1070_p0)
}
 0x22e   :  { %s1074_s4 = scalar_lea.hbm %s1206_s5, 128 }
 0x22f   :  { %p1075_p1 = scmp.ne.s32.totalorder %s1206_s5, %s1074_s4  ;;  %p1078_p2 = scmp.lt.u32.totalorder %s1074_s4, %s1206_s5 }
 0x231   :  { %p1080_p3 = pnand %p1078_p2, %p1075_p1 }
 0x233   :  { %1083 = shalt.err (!%p1080_p3)
}
 0x234   :  { %761 = dma.vmem_to_hbm [thread:$0]  %s759_s7, 128, %s1206_s5, [#allocation4]  }
 0x235   :  { %1088 = dma.done.wait [#allocation4], 128  }
 0x236   :  { %1089 = vsyncadd [#allocation4], 4294967168 }
 0x237   :  { %765 = vsyncpa [#allocation3], 1 }
 0x238   :  { %766 = vsyncpa [#allocation6], 1 }
 0x239   :  { %767 = vsyncpa [#allocation4], 1 }

</bundles_post_ra>
